<compile_context>
chip_gen: v7x
topology: tpu7x:2x2x1
jax: 0.10.0
libtpu: 0.0.40
codegen_flags: <defaults>
</compile_context>

<pallas_src>
import functools

import jax
import jax.numpy as jnp
from jax import lax
from jax.experimental import pallas as pl
from jax.experimental.pallas import tpu as pltpu

EPS = 1e-5          # nn.LayerNorm default eps
NEG_INF = -1e9      # bias for padded (fake) classes so softmax ignores them


def _round_up(x, m):
    return (x + m - 1) // m * m


def _padded_bytes(shape, itemsize=4):
    s = list(shape)
    s[-1] = _round_up(s[-1], 128)
    if len(s) >= 2:
        s[-2] = _round_up(s[-2], 8)
    n = 1
    for d in s:
        n *= d
    return n * itemsize


# ---------------------------------------------------------------------------
# Fused kernel: conv1 (1->C, 3x3, stride 2) + Residual (2x [conv3x3 + LN(freq) + ReLU])
#               + residual add + FC + log_softmax.  One batch element per grid step.
# Activation layout: [t, f*C + c]  (time in sublanes, freq x channel in lanes).
# ---------------------------------------------------------------------------
def _make_fused_kernel(T1, T1o, FC, NP, mxu_dtype):
    def kernel(xev_ref, xod_ref, w1_ref, b1_ref, wr1_ref, br1_ref,
               wr2_ref, br2_ref, rmat_ref, g_ref, be_ref, wfc_ref, bfc_ref,
               log_ref, pbuf_ref):
        def mm(a, b):  # MXU matmul, bf16/f32 operands, f32 accumulate
            return jnp.dot(a.astype(mxu_dtype), b.astype(mxu_dtype),
                           preferred_element_type=jnp.float32)

        # ---- conv1: 3 matmuls (one per time tap) against stride-2 banded weights ----
        # even rows hold input times 2t-1, odd rows 2t (zero row for t=-1 / t=T).
        y1 = (mm(xev_ref[pl.ds(0, T1), :], w1_ref[0])      # kx = 0  -> t_in = 2t - 1
              + mm(xod_ref[pl.ds(0, T1), :], w1_ref[1])    # kx = 1  -> t_in = 2t
              + mm(xev_ref[pl.ds(1, T1), :], w1_ref[2])    # kx = 2  -> t_in = 2t + 1
              + b1_ref[...])                               # [T1, FC] f32

        # Zero ONLY the two time-padding rows the conv taps read (row 0 and row T1+1);
        # the interior rows are fully rewritten before every read.
        zrow = jnp.zeros((1, FC), jnp.float32)
        pbuf_ref[pl.ds(0, 1), :] = zrow
        pbuf_ref[pl.ds(T1 + 1, 1), :] = zrow

        rmat = rmat_ref[...]            # [FC, FC] freq-averaging matrix (f32)
        g = g_ref[...]                  # [1, FC] gamma expanded over channels
        be = be_ref[...]                # [1, FC] beta  expanded over channels

        def conv3x3(w_ref, b_row):
            # 3x3 conv = 3 matmuls with K = FC against block-banded-over-freq weights.
            acc = mm(pbuf_ref[pl.ds(0, T1), :], w_ref[0])
            acc = acc + mm(pbuf_ref[pl.ds(1, T1), :], w_ref[1])
            acc = acc + mm(pbuf_ref[pl.ds(2, T1), :], w_ref[2])
            return acc + b_row

        def ln_relu(y):
            # LayerNorm over freq per (t, c): mean/var via the [FC, FC] averaging matmul
            # (stays lane-dense; statistics kept in f32 regardless of MXU dtype).
            mu = jnp.dot(y, rmat, preferred_element_type=jnp.float32)
            d = y - mu
            var = jnp.dot(d * d, rmat, preferred_element_type=jnp.float32)
            return jnp.maximum(d * lax.rsqrt(var + EPS) * g + be, 0.0)

        # ---- Residual block (shared LayerNorm instance) + residual add ----
        pbuf_ref[pl.ds(1, T1), :] = y1
        h = ln_relu(conv3x3(wr1_ref, br1_ref[...]))
        pbuf_ref[pl.ds(1, T1), :] = h
        h = ln_relu(conv3x3(wr2_ref, br2_ref[...]))
        res = y1 + h                                        # [T1, FC]

        # ---- FC: single K = FC matmul into the lane-dense (padded) class dim ----
        logits = mm(res, wfc_ref[...]) + bfc_ref[...]       # [T1, NP]

        # ---- log_softmax (only output; prob = exp(log) on the host) ----
        m = jnp.max(logits, axis=-1, keepdims=True)
        z = logits - m
        lse = jnp.log(jnp.sum(jnp.exp(z), axis=-1, keepdims=True))
        out = z - lse
        if T1 == T1o:
            log_ref[...] = out
        else:
            log_ref[...] = jnp.zeros((T1o, NP), jnp.float32)
            log_ref[pl.ds(0, T1), :] = out

    return kernel


# ---------------------------------------------------------------------------
# ConvRes forward (single pallas_call)
# ---------------------------------------------------------------------------
def conv_res_forward(params, x_mag, seq_len, *, mxu_dtype=jnp.bfloat16):
    f32 = jnp.float32
    B, F, T = x_mag.shape
    C = params["w1"].shape[0]
    out_dim = params["wfc"].shape[1]
    F1 = (F + 2 - 3) // 2 + 1            # n_feats // 2 + 1
    T1 = (T + 2 - 3) // 2 + 1
    FC = F1 * C                          # lane width of all activations
    NP = _round_up(out_dim, 128)         # lane-dense class dim
    T1o = _round_up(T1, 8)               # output rows (sublane-aligned)
    Tev = _round_up(T1 + 1, 8)           # rows of each parity-deinterleaved input
    Tbuf = _round_up(T1 + 2, 8)          # time-padded stencil scratch rows

    x_mag = x_mag.astype(f32)

    # ---- input prep: time-pad + parity-deinterleave (1x data, no im2col) ----
    xt = jnp.transpose(x_mag, (0, 2, 1))                    # [B, T, F]
    rows = 2 * T1 + 1                                       # padded rows r = t + 1
    xpt = jnp.pad(xt, ((0, 0), (1, max(rows - (T + 1), 0)), (0, 0)))[:, :rows]
    xev = xpt[:, 0::2]                                      # [B, T1+1, F]  (t = 2j - 1)
    xod = xpt[:, 1::2]                                      # [B, T1,   F]  (t = 2j)
    xev = jnp.pad(xev, ((0, 0), (0, Tev - xev.shape[1]), (0, 0)))
    xod = jnp.pad(xod, ((0, 0), (0, Tev - xod.shape[1]), (0, 0)))

    # ---- weight repacking (constant-folded: params are closed-over constants) ----
    w1 = params["w1"].astype(f32)        # [C, 1, 3, 3]
    wr1 = params["wr1"].astype(f32)      # [C, C, 3, 3]
    wr2 = params["wr2"].astype(f32)

    def band_res_w(w):
        # [3, FC, FC]: W[kx][fi*C + ci, fo*C + co] = w[co, ci, ky=fi-fo+1, kx]
        return jnp.stack([
            sum(jnp.kron(jnp.eye(F1, k=1 - ky, dtype=f32), w[:, :, ky, kx].T)
                for ky in range(3))
            for kx in range(3)])

    fo_idx = jnp.arange(F1)
    fi_idx = jnp.arange(F)[:, None]

    def band_in_w(w):
        # [3, F, FC]: W[kx][f_in, fo*C + c] = w[c, 0, ky, kx] where f_in = 2*fo + ky - 1
        return jnp.stack([
            sum(jnp.kron((fi_idx == (2 * fo_idx + ky - 1)[None, :]).astype(f32),
                         w[:, 0, ky, kx][None, :])
                for ky in range(3))
            for kx in range(3)])

    w1b = band_in_w(w1)                                     # [3, F, FC]
    wr1b = band_res_w(wr1)                                  # [3, FC, FC]
    wr2b = band_res_w(wr2)
    b1r = jnp.tile(params["b1"].astype(f32), F1).reshape(1, FC)
    br1r = jnp.tile(params["br1"].astype(f32), F1).reshape(1, FC)
    br2r = jnp.tile(params["br2"].astype(f32), F1).reshape(1, FC)
    g_row = jnp.repeat(params["gamma"].astype(f32), C).reshape(1, FC)
    be_row = jnp.repeat(params["beta"].astype(f32), C).reshape(1, FC)
    rmat = jnp.kron(jnp.ones((F1, F1), f32), jnp.eye(C, dtype=f32)) / F1   # [FC, FC]
    # PyTorch flattens features as (C, F1) c-major; repack to lane order f*C + c.
    wfc_r = params["wfc"].astype(f32).reshape(C, F1, out_dim)
    wfc_r = wfc_r.transpose(1, 0, 2).reshape(FC, out_dim)
    wfc_p = jnp.pad(wfc_r, ((0, 0), (0, NP - out_dim)))
    bfc_p = jnp.pad(params["bfc"].astype(f32), (0, NP - out_dim),
                    constant_values=NEG_INF).reshape(1, NP)

    kernel = _make_fused_kernel(T1, T1o, FC, NP, mxu_dtype)

    in_specs = [
        pl.BlockSpec((None, Tev, F), lambda b: (b, 0, 0)),   # x even-parity rows
        pl.BlockSpec((None, Tev, F), lambda b: (b, 0, 0)),   # x odd-parity rows
        pl.BlockSpec((3, F, FC), lambda b: (0, 0, 0)),       # conv1 banded weights
        pl.BlockSpec((1, FC), lambda b: (0, 0)),             # conv1 bias (expanded)
        pl.BlockSpec((3, FC, FC), lambda b: (0, 0, 0)),      # res conv1 banded weights
        pl.BlockSpec((1, FC), lambda b: (0, 0)),             # res conv1 bias
        pl.BlockSpec((3, FC, FC), lambda b: (0, 0, 0)),      # res conv2 banded weights
        pl.BlockSpec((1, FC), lambda b: (0, 0)),             # res conv2 bias
        pl.BlockSpec((FC, FC), lambda b: (0, 0)),            # LN freq-averaging matrix
        pl.BlockSpec((1, FC), lambda b: (0, 0)),             # gamma (expanded)
        pl.BlockSpec((1, FC), lambda b: (0, 0)),             # beta  (expanded)
        pl.BlockSpec((FC, NP), lambda b: (0, 0)),            # fc weight (padded classes)
        pl.BlockSpec((1, NP), lambda b: (0, 0)),             # fc bias (padded, NEG_INF)
    ]
    out_spec = pl.BlockSpec((None, T1o, NP), lambda b: (b, 0, 0))

    # VMEM budget sized from the actual (sublane/lane padded) buffers (review item).
    block_shapes = [(Tev, F), (Tev, F), (3, F, FC), (1, FC), (3, FC, FC), (1, FC),
                    (3, FC, FC), (1, FC), (FC, FC), (1, FC), (1, FC), (FC, NP),
                    (1, NP), (T1o, NP), (Tbuf, FC)]
    vmem_need = sum(_padded_bytes(s) for s in block_shapes)
    vmem_limit = int(min(64 * 2 ** 20, max(4 * vmem_need, 16 * 2 ** 20)))

    log_p = pl.pallas_call(
        kernel,
        out_shape=jax.ShapeDtypeStruct((B, T1o, NP), f32),
        grid=(B,),
        in_specs=in_specs,
        out_specs=out_spec,
        scratch_shapes=[pltpu.VMEM((Tbuf, FC), jnp.float32)],   # time-padded stencil buf
        compiler_params=pltpu.CompilerParams(
            dimension_semantics=("parallel",),
            vmem_limit_bytes=vmem_limit),
    )(xev, xod, w1b, b1r, wr1b, br1r, wr2b, br2r, rmat, g_row, be_row, wfc_p, bfc_p)

    # Drop padded classes / padded frames (tiny) and go to [T1, B, out_dim].
    log = jnp.transpose(log_p[:, :T1, :out_dim], (1, 0, 2))
    prob = jnp.exp(log)      # exact softmax, no second HBM store from the kernel

    # _calc_func(seq_len): k=3, stride=2, pad=1, dilation=1 (tiny scalar math)
    seq_out = jnp.floor(
        (seq_len.astype(jnp.float32) + 2 * (3 // 2) - 1 * (3 - 1) - 1) / 2 + 1
    ).astype(jnp.int32)
    return log, prob, seq_out


# ---------------------------------------------------------------------------
# Deterministic parameter init (synthetic — no checkpoint loading)
# ---------------------------------------------------------------------------
def init_params(key, n_channels, n_feats, out_dim):
    F1 = n_feats // 2 + 1
    in_dim = F1 * n_channels
    ks = jax.random.split(key, 10)

    def nrm(k, shape, scale=0.1):
        return scale * jax.random.normal(k, shape, dtype=jnp.float32)

    return {
        "w1": nrm(ks[0], (n_channels, 1, 3, 3)),
        "b1": nrm(ks[1], (n_channels,)),
        "wr1": nrm(ks[2], (n_channels, n_channels, 3, 3)),
        "br1": nrm(ks[3], (n_channels,)),
        "wr2": nrm(ks[4], (n_channels, n_channels, 3, 3)),
        "br2": nrm(ks[5], (n_channels,)),
        # CNNLayerNorm is a single shared instance for both conv blocks.
        "gamma": 1.0 + nrm(ks[6], (F1,)),
        "beta": nrm(ks[7], (F1,)),
        "wfc": nrm(ks[8], (in_dim, out_dim)),
        "bfc": nrm(ks[9], (out_dim,)),
    }


# ---------------------------------------------------------------------------
# Pure-JAX reference (for correctness check)
# ---------------------------------------------------------------------------
def reference(params, x_mag, seq_len):
    prec = lax.Precision.HIGHEST
    dn = ("NCHW", "OIHW", "NCHW")

    def ln(z):  # LayerNorm over the freq dim (axis 2) a la CNNLayerNorm
        zt = jnp.transpose(z, (0, 1, 3, 2))
        mu = zt.mean(-1, keepdims=True)
        var = ((zt - mu) ** 2).mean(-1, keepdims=True)
        zt = (zt - mu) / jnp.sqrt(var + EPS) * params["gamma"] + params["beta"]
        return jnp.transpose(zt, (0, 1, 3, 2))

    def conv_block(z, w, b):
        c = lax.conv_general_dilated(
            z, w, (1, 1), ((1, 1), (1, 1)), dimension_numbers=dn, precision=prec
        ) + b[None, :, None, None]
        return jax.nn.relu(ln(c))

    x = x_mag[:, None]
    y = lax.conv_general_dilated(
        x, params["w1"], (2, 2), ((1, 1), (1, 1)), dimension_numbers=dn, precision=prec
    ) + params["b1"][None, :, None, None]
    h = conv_block(y, params["wr1"], params["br1"])
    h = conv_block(h, params["wr2"], params["br2"])
    z = y + h
    s0, s1, s2, s3 = z.shape
    z = z.reshape(s0, s1 * s2, s3)
    z = jnp.transpose(z, (2, 0, 1))
    logits = jnp.einsum("tbi,io->tbo", z, params["wfc"], precision=prec) + params["bfc"]
    log = jax.nn.log_softmax(logits, axis=-1)
    prob = jax.nn.softmax(logits, axis=-1)
    seq_out = jnp.floor(
        (seq_len.astype(jnp.float32) + 2 * (3 // 2) - 1 * (3 - 1) - 1) / 2 + 1
    ).astype(jnp.int32)
    return log, prob, seq_out


# ---------------------------------------------------------------------------
if __name__ == "__main__":
    B, n_channels, kernel_size, stride, n_feats, out_dim = 2, 4, 3, 2, 32, 16
    T = 16
    F = n_feats + 1                      # freq bins s.t. stride-2 conv yields n_feats//2 + 1
    T1 = (T + 2 - 3) // 2 + 1

    key = jax.random.PRNGKey(0)
    kx_, kp_ = jax.random.split(key)
    x_mag = jax.random.uniform(kx_, (B, F, T), dtype=jnp.float32)
    seq_len = jnp.array([T, T - 3], dtype=jnp.int32)
    params = init_params(kp_, n_channels, n_feats, out_dim)

    log_r, prob_r, seq_r = reference(params, x_mag, seq_len)

    # f32 MXU operands: tight check validates the layout / algorithm exactly.
    fwd_f32 = jax.jit(functools.partial(conv_res_forward, params, mxu_dtype=jnp.float32))
    log32, prob32, seq32 = fwd_f32(x_mag, seq_len)
    jax.block_until_ready((log32, prob32, seq32))

    # bf16 MXU operands (recommended production setting on v5e/v6e/v7x): looser check.
    fwd_bf16 = jax.jit(functools.partial(conv_res_forward, params, mxu_dtype=jnp.bfloat16))
    log16, prob16, seq16 = fwd_bf16(x_mag, seq_len)
    jax.block_until_ready((log16, prob16, seq16))

    assert log32.shape == (T1, B, out_dim), log32.shape
    assert prob32.shape == (T1, B, out_dim), prob32.shape
    assert seq32.shape == (B,), seq32.shape
    assert bool(jnp.allclose(log32, log_r, atol=2e-3, rtol=2e-3)), "f32 log_softmax mismatch"
    assert bool(jnp.allclose(prob32, prob_r, atol=2e-3, rtol=2e-3)), "f32 softmax mismatch"
    assert bool(jnp.all(seq32 == seq_r)), "seq_len mismatch"
    # bf16 matmul operands legitimately carry ~1e-2-level error through 2x LN + FC.
    assert bool(jnp.allclose(log16, log_r, atol=5e-2, rtol=5e-2)), "bf16 log_softmax mismatch"
    assert bool(jnp.allclose(prob16, prob_r, atol=5e-2, rtol=5e-2)), "bf16 softmax mismatch"
    assert bool(jnp.all(seq16 == seq_r)), "seq_len mismatch (bf16)"

    print("KERNEL_OK")
</pallas_src>

<mosaic_0001>
module attributes {stable_mosaic.version = 11 : i64} {
  func.func @kernel(%arg0: i32, %arg1: memref<1x16x33xf32, #tpu.memory_space<vmem>>, %arg2: memref<1x16x33xf32, #tpu.memory_space<vmem>>, %arg3: memref<3x33x68xf32, #tpu.memory_space<vmem>>, %arg4: memref<1x68xf32, #tpu.memory_space<vmem>>, %arg5: memref<3x68x68xf32, #tpu.memory_space<vmem>>, %arg6: memref<1x68xf32, #tpu.memory_space<vmem>>, %arg7: memref<3x68x68xf32, #tpu.memory_space<vmem>>, %arg8: memref<1x68xf32, #tpu.memory_space<vmem>>, %arg9: memref<68x68xf32, #tpu.memory_space<vmem>>, %arg10: memref<1x68xf32, #tpu.memory_space<vmem>>, %arg11: memref<1x68xf32, #tpu.memory_space<vmem>>, %arg12: memref<68x128xf32, #tpu.memory_space<vmem>>, %arg13: memref<1x128xf32, #tpu.memory_space<vmem>>, %arg14: memref<1x8x128xf32, #tpu.memory_space<vmem>>, %arg15: memref<16x68xf32, #tpu.memory_space<vmem>>) attributes {dimension_semantics = [#tpu.dimension_semantics<parallel>], iteration_bounds = array<i64: 2>, scalar_prefetch = 0 : i64, scratch_operands = 1 : i64, tpu.core_type = #tpu.core_type<tc>, window_params = [{transform_indices = @transform_0, window_bounds = array<i64: 1, 16, 33>}, {transform_indices = @transform_1, window_bounds = array<i64: 1, 16, 33>}, {pipeline_mode = #tpu.pipeline_mode<synchronous>, transform_indices = @transform_2, window_bounds = array<i64: 3, 33, 68>}, {pipeline_mode = #tpu.pipeline_mode<synchronous>, transform_indices = @transform_3, window_bounds = array<i64: 1, 68>}, {pipeline_mode = #tpu.pipeline_mode<synchronous>, transform_indices = @transform_4, window_bounds = array<i64: 3, 68, 68>}, {pipeline_mode = #tpu.pipeline_mode<synchronous>, transform_indices = @transform_5, window_bounds = array<i64: 1, 68>}, {pipeline_mode = #tpu.pipeline_mode<synchronous>, transform_indices = @transform_6, window_bounds = array<i64: 3, 68, 68>}, {pipeline_mode = #tpu.pipeline_mode<synchronous>, transform_indices = @transform_7, window_bounds = array<i64: 1, 68>}, {pipeline_mode = #tpu.pipeline_mode<synchronous>, transform_indices = @transform_8, window_bounds = array<i64: 68, 68>}, {pipeline_mode = #tpu.pipeline_mode<synchronous>, transform_indices = @transform_9, window_bounds = array<i64: 1, 68>}, {pipeline_mode = #tpu.pipeline_mode<synchronous>, transform_indices = @transform_10, window_bounds = array<i64: 1, 68>}, {pipeline_mode = #tpu.pipeline_mode<synchronous>, transform_indices = @transform_11, window_bounds = array<i64: 68, 128>}, {pipeline_mode = #tpu.pipeline_mode<synchronous>, transform_indices = @transform_12, window_bounds = array<i64: 1, 128>}, {transform_indices = @transform_13, window_bounds = array<i64: 1, 8, 128>}]} {
    %c0 = arith.constant 0 : index
    %c0_0 = arith.constant 0 : index
    %c0_1 = arith.constant 0 : index
    %0 = vector.load %arg1[%c0, %c0_0, %c0_1] : memref<1x16x33xf32, #tpu.memory_space<vmem>>, vector<1x8x33xf32>
    %1 = vector.shape_cast %0 : vector<1x8x33xf32> to vector<8x33xf32>
    %c0_2 = arith.constant 0 : index
    %c0_3 = arith.constant 0 : index
    %c0_4 = arith.constant 0 : index
    %2 = vector.load %arg3[%c0_2, %c0_3, %c0_4] : memref<3x33x68xf32, #tpu.memory_space<vmem>>, vector<1x33x68xf32>
    %3 = vector.shape_cast %2 : vector<1x33x68xf32> to vector<33x68xf32>
    %cst = arith.constant dense<0.000000e+00> : vector<8x68xf32>
    %4 = tpu.matmul %1, %3, %cst {dimension_numbers = #tpu.dot_dimension_numbers<[1], [0], [0], [1], [0, 0, 1, 1], [], []>} : vector<8x33xf32>, vector<33x68xf32>, vector<8x68xf32> -> vector<8x68xf32>
    %c0_5 = arith.constant 0 : index
    %c0_6 = arith.constant 0 : index
    %c0_7 = arith.constant 0 : index
    %5 = vector.load %arg2[%c0_5, %c0_6, %c0_7] : memref<1x16x33xf32, #tpu.memory_space<vmem>>, vector<1x8x33xf32>
    %6 = vector.shape_cast %5 : vector<1x8x33xf32> to vector<8x33xf32>
    %c1 = arith.constant 1 : index
    %c0_8 = arith.constant 0 : index
    %c0_9 = arith.constant 0 : index
    %7 = vector.load %arg3[%c1, %c0_8, %c0_9] : memref<3x33x68xf32, #tpu.memory_space<vmem>>, vector<1x33x68xf32>
    %8 = vector.shape_cast %7 : vector<1x33x68xf32> to vector<33x68xf32>
    %cst_10 = arith.constant dense<0.000000e+00> : vector<8x68xf32>
    %9 = tpu.matmul %6, %8, %cst_10 {dimension_numbers = #tpu.dot_dimension_numbers<[1], [0], [0], [1], [0, 0, 1, 1], [], []>} : vector<8x33xf32>, vector<33x68xf32>, vector<8x68xf32> -> vector<8x68xf32>
    %10 = arith.addf %4, %9 : vector<8x68xf32>
    %c0_11 = arith.constant 0 : index
    %c1_12 = arith.constant 1 : index
    %c0_13 = arith.constant 0 : index
    %11 = vector.load %arg1[%c0_11, %c1_12, %c0_13] : memref<1x16x33xf32, #tpu.memory_space<vmem>>, vector<1x8x33xf32>
    %12 = vector.shape_cast %11 : vector<1x8x33xf32> to vector<8x33xf32>
    %c2 = arith.constant 2 : index
    %c0_14 = arith.constant 0 : index
    %c0_15 = arith.constant 0 : index
    %13 = vector.load %arg3[%c2, %c0_14, %c0_15] : memref<3x33x68xf32, #tpu.memory_space<vmem>>, vector<1x33x68xf32>
    %14 = vector.shape_cast %13 : vector<1x33x68xf32> to vector<33x68xf32>
    %cst_16 = arith.constant dense<0.000000e+00> : vector<8x68xf32>
    %15 = tpu.matmul %12, %14, %cst_16 {dimension_numbers = #tpu.dot_dimension_numbers<[1], [0], [0], [1], [0, 0, 1, 1], [], []>} : vector<8x33xf32>, vector<33x68xf32>, vector<8x68xf32> -> vector<8x68xf32>
    %16 = arith.addf %10, %15 : vector<8x68xf32>
    %c0_17 = arith.constant 0 : index
    %c0_18 = arith.constant 0 : index
    %17 = vector.load %arg4[%c0_17, %c0_18] : memref<1x68xf32, #tpu.memory_space<vmem>>, vector<1x68xf32>
    %18 = vector.broadcast %17 : vector<1x68xf32> to vector<8x68xf32>
    %19 = arith.addf %16, %18 : vector<8x68xf32>
    %cst_19 = arith.constant 0.000000e+00 : f32
    %20 = vector.broadcast %cst_19 : f32 to vector<1x68xf32>
    %c0_20 = arith.constant 0 : index
    %c0_21 = arith.constant 0 : index
    %21 = vector.load %arg15[%c0_20, %c0_21] : memref<16x68xf32, #tpu.memory_space<vmem>>, vector<1x68xf32>
    tpu.vector_store %arg15[%c0_20, %c0_21], %20 {strides = array<i32>} : memref<16x68xf32, #tpu.memory_space<vmem>>, vector<1x68xf32>,
    %c9 = arith.constant 9 : index
    %c0_22 = arith.constant 0 : index
    %22 = vector.load %arg15[%c9, %c0_22] : memref<16x68xf32, #tpu.memory_space<vmem>>, vector<1x68xf32>
    tpu.vector_store %arg15[%c9, %c0_22], %20 {strides = array<i32>} : memref<16x68xf32, #tpu.memory_space<vmem>>, vector<1x68xf32>,
    %c0_23 = arith.constant 0 : index
    %c0_24 = arith.constant 0 : index
    %23 = vector.load %arg9[%c0_23, %c0_24] : memref<68x68xf32, #tpu.memory_space<vmem>>, vector<68x68xf32>
    %c0_25 = arith.constant 0 : index
    %c0_26 = arith.constant 0 : index
    %24 = vector.load %arg10[%c0_25, %c0_26] : memref<1x68xf32, #tpu.memory_space<vmem>>, vector<1x68xf32>
    %c0_27 = arith.constant 0 : index
    %c0_28 = arith.constant 0 : index
    %25 = vector.load %arg11[%c0_27, %c0_28] : memref<1x68xf32, #tpu.memory_space<vmem>>, vector<1x68xf32>
    %c1_29 = arith.constant 1 : index
    %c0_30 = arith.constant 0 : index
    %26 = vector.load %arg15[%c1_29, %c0_30] : memref<16x68xf32, #tpu.memory_space<vmem>>, vector<8x68xf32>
    tpu.vector_store %arg15[%c1_29, %c0_30], %19 {strides = array<i32>} : memref<16x68xf32, #tpu.memory_space<vmem>>, vector<8x68xf32>,
    %c0_31 = arith.constant 0 : index
    %c0_32 = arith.constant 0 : index
    %27 = vector.load %arg6[%c0_31, %c0_32] : memref<1x68xf32, #tpu.memory_space<vmem>>, vector<1x68xf32>
    %c0_33 = arith.constant 0 : index
    %c0_34 = arith.constant 0 : index
    %28 = vector.load %arg15[%c0_33, %c0_34] : memref<16x68xf32, #tpu.memory_space<vmem>>, vector<8x68xf32>
    %c0_35 = arith.constant 0 : index
    %c0_36 = arith.constant 0 : index
    %c0_37 = arith.constant 0 : index
    %29 = vector.load %arg5[%c0_35, %c0_36, %c0_37] : memref<3x68x68xf32, #tpu.memory_space<vmem>>, vector<1x68x68xf32>
    %30 = vector.shape_cast %29 : vector<1x68x68xf32> to vector<68x68xf32>
    %cst_38 = arith.constant dense<0.000000e+00> : vector<8x68xf32>
    %31 = tpu.matmul %28, %30, %cst_38 {dimension_numbers = #tpu.dot_dimension_numbers<[1], [0], [0], [1], [0, 0, 1, 1], [], []>} : vector<8x68xf32>, vector<68x68xf32>, vector<8x68xf32> -> vector<8x68xf32>
    %c1_39 = arith.constant 1 : index
    %c0_40 = arith.constant 0 : index
    %32 = vector.load %arg15[%c1_39, %c0_40] : memref<16x68xf32, #tpu.memory_space<vmem>>, vector<8x68xf32>
    %c1_41 = arith.constant 1 : index
    %c0_42 = arith.constant 0 : index
    %c0_43 = arith.constant 0 : index
    %33 = vector.load %arg5[%c1_41, %c0_42, %c0_43] : memref<3x68x68xf32, #tpu.memory_space<vmem>>, vector<1x68x68xf32>
    %34 = vector.shape_cast %33 : vector<1x68x68xf32> to vector<68x68xf32>
    %cst_44 = arith.constant dense<0.000000e+00> : vector<8x68xf32>
    %35 = tpu.matmul %32, %34, %cst_44 {dimension_numbers = #tpu.dot_dimension_numbers<[1], [0], [0], [1], [0, 0, 1, 1], [], []>} : vector<8x68xf32>, vector<68x68xf32>, vector<8x68xf32> -> vector<8x68xf32>
    %36 = arith.addf %31, %35 : vector<8x68xf32>
    %c2_45 = arith.constant 2 : index
    %c0_46 = arith.constant 0 : index
    %37 = vector.load %arg15[%c2_45, %c0_46] : memref<16x68xf32, #tpu.memory_space<vmem>>, vector<8x68xf32>
    %c2_47 = arith.constant 2 : index
    %c0_48 = arith.constant 0 : index
    %c0_49 = arith.constant 0 : index
    %38 = vector.load %arg5[%c2_47, %c0_48, %c0_49] : memref<3x68x68xf32, #tpu.memory_space<vmem>>, vector<1x68x68xf32>
    %39 = vector.shape_cast %38 : vector<1x68x68xf32> to vector<68x68xf32>
    %cst_50 = arith.constant dense<0.000000e+00> : vector<8x68xf32>
    %40 = tpu.matmul %37, %39, %cst_50 {dimension_numbers = #tpu.dot_dimension_numbers<[1], [0], [0], [1], [0, 0, 1, 1], [], []>} : vector<8x68xf32>, vector<68x68xf32>, vector<8x68xf32> -> vector<8x68xf32>
    %41 = arith.addf %36, %40 : vector<8x68xf32>
    %42 = vector.broadcast %27 : vector<1x68xf32> to vector<8x68xf32>
    %43 = arith.addf %41, %42 : vector<8x68xf32>
    %cst_51 = arith.constant dense<0.000000e+00> : vector<8x68xf32>
    %44 = tpu.matmul %43, %23, %cst_51 {dimension_numbers = #tpu.dot_dimension_numbers<[1], [0], [0], [1], [0, 0, 1, 1], [], []>} : vector<8x68xf32>, vector<68x68xf32>, vector<8x68xf32> -> vector<8x68xf32>
    %45 = arith.subf %43, %44 : vector<8x68xf32>
    %46 = arith.mulf %45, %45 : vector<8x68xf32>
    %cst_52 = arith.constant dense<0.000000e+00> : vector<8x68xf32>
    %47 = tpu.matmul %46, %23, %cst_52 {dimension_numbers = #tpu.dot_dimension_numbers<[1], [0], [0], [1], [0, 0, 1, 1], [], []>} : vector<8x68xf32>, vector<68x68xf32>, vector<8x68xf32> -> vector<8x68xf32>
    %cst_53 = arith.constant 9.99999974E-6 : f32
    %48 = vector.broadcast %cst_53 : f32 to vector<8x68xf32>
    %49 = arith.addf %47, %48 : vector<8x68xf32>
    %50 = math.rsqrt %49 : vector<8x68xf32>
    %51 = arith.mulf %45, %50 : vector<8x68xf32>
    %52 = vector.broadcast %24 : vector<1x68xf32> to vector<8x68xf32>
    %53 = arith.mulf %51, %52 : vector<8x68xf32>
    %54 = vector.broadcast %25 : vector<1x68xf32> to vector<8x68xf32>
    %55 = arith.addf %53, %54 : vector<8x68xf32>
    %cst_54 = arith.constant 0.000000e+00 : f32
    %56 = vector.broadcast %cst_54 : f32 to vector<8x68xf32>
    %57 = arith.maximumf %55, %56 : vector<8x68xf32>
    %c1_55 = arith.constant 1 : index
    %c0_56 = arith.constant 0 : index
    %58 = vector.load %arg15[%c1_55, %c0_56] : memref<16x68xf32, #tpu.memory_space<vmem>>, vector<8x68xf32>
    tpu.vector_store %arg15[%c1_55, %c0_56], %57 {strides = array<i32>} : memref<16x68xf32, #tpu.memory_space<vmem>>, vector<8x68xf32>,
    %c0_57 = arith.constant 0 : index
    %c0_58 = arith.constant 0 : index
    %59 = vector.load %arg8[%c0_57, %c0_58] : memref<1x68xf32, #tpu.memory_space<vmem>>, vector<1x68xf32>
    %c0_59 = arith.constant 0 : index
    %c0_60 = arith.constant 0 : index
    %60 = vector.load %arg15[%c0_59, %c0_60] : memref<16x68xf32, #tpu.memory_space<vmem>>, vector<8x68xf32>
    %c0_61 = arith.constant 0 : index
    %c0_62 = arith.constant 0 : index
    %c0_63 = arith.constant 0 : index
    %61 = vector.load %arg7[%c0_61, %c0_62, %c0_63] : memref<3x68x68xf32, #tpu.memory_space<vmem>>, vector<1x68x68xf32>
    %62 = vector.shape_cast %61 : vector<1x68x68xf32> to vector<68x68xf32>
    %cst_64 = arith.constant dense<0.000000e+00> : vector<8x68xf32>
    %63 = tpu.matmul %60, %62, %cst_64 {dimension_numbers = #tpu.dot_dimension_numbers<[1], [0], [0], [1], [0, 0, 1, 1], [], []>} : vector<8x68xf32>, vector<68x68xf32>, vector<8x68xf32> -> vector<8x68xf32>
    %c1_65 = arith.constant 1 : index
    %c0_66 = arith.constant 0 : index
    %64 = vector.load %arg15[%c1_65, %c0_66] : memref<16x68xf32, #tpu.memory_space<vmem>>, vector<8x68xf32>
    %c1_67 = arith.constant 1 : index
    %c0_68 = arith.constant 0 : index
    %c0_69 = arith.constant 0 : index
    %65 = vector.load %arg7[%c1_67, %c0_68, %c0_69] : memref<3x68x68xf32, #tpu.memory_space<vmem>>, vector<1x68x68xf32>
    %66 = vector.shape_cast %65 : vector<1x68x68xf32> to vector<68x68xf32>
    %cst_70 = arith.constant dense<0.000000e+00> : vector<8x68xf32>
    %67 = tpu.matmul %64, %66, %cst_70 {dimension_numbers = #tpu.dot_dimension_numbers<[1], [0], [0], [1], [0, 0, 1, 1], [], []>} : vector<8x68xf32>, vector<68x68xf32>, vector<8x68xf32> -> vector<8x68xf32>
    %68 = arith.addf %63, %67 : vector<8x68xf32>
    %c2_71 = arith.constant 2 : index
    %c0_72 = arith.constant 0 : index
    %69 = vector.load %arg15[%c2_71, %c0_72] : memref<16x68xf32, #tpu.memory_space<vmem>>, vector<8x68xf32>
    %c2_73 = arith.constant 2 : index
    %c0_74 = arith.constant 0 : index
    %c0_75 = arith.constant 0 : index
    %70 = vector.load %arg7[%c2_73, %c0_74, %c0_75] : memref<3x68x68xf32, #tpu.memory_space<vmem>>, vector<1x68x68xf32>
    %71 = vector.shape_cast %70 : vector<1x68x68xf32> to vector<68x68xf32>
    %cst_76 = arith.constant dense<0.000000e+00> : vector<8x68xf32>
    %72 = tpu.matmul %69, %71, %cst_76 {dimension_numbers = #tpu.dot_dimension_numbers<[1], [0], [0], [1], [0, 0, 1, 1], [], []>} : vector<8x68xf32>, vector<68x68xf32>, vector<8x68xf32> -> vector<8x68xf32>
    %73 = arith.addf %68, %72 : vector<8x68xf32>
    %74 = vector.broadcast %59 : vector<1x68xf32> to vector<8x68xf32>
    %75 = arith.addf %73, %74 : vector<8x68xf32>
    %cst_77 = arith.constant dense<0.000000e+00> : vector<8x68xf32>
    %76 = tpu.matmul %75, %23, %cst_77 {dimension_numbers = #tpu.dot_dimension_numbers<[1], [0], [0], [1], [0, 0, 1, 1], [], []>} : vector<8x68xf32>, vector<68x68xf32>, vector<8x68xf32> -> vector<8x68xf32>
    %77 = arith.subf %75, %76 : vector<8x68xf32>
    %78 = arith.mulf %77, %77 : vector<8x68xf32>
    %cst_78 = arith.constant dense<0.000000e+00> : vector<8x68xf32>
    %79 = tpu.matmul %78, %23, %cst_78 {dimension_numbers = #tpu.dot_dimension_numbers<[1], [0], [0], [1], [0, 0, 1, 1], [], []>} : vector<8x68xf32>, vector<68x68xf32>, vector<8x68xf32> -> vector<8x68xf32>
    %cst_79 = arith.constant 9.99999974E-6 : f32
    %80 = vector.broadcast %cst_79 : f32 to vector<8x68xf32>
    %81 = arith.addf %79, %80 : vector<8x68xf32>
    %82 = math.rsqrt %81 : vector<8x68xf32>
    %83 = arith.mulf %77, %82 : vector<8x68xf32>
    %84 = vector.broadcast %24 : vector<1x68xf32> to vector<8x68xf32>
    %85 = arith.mulf %83, %84 : vector<8x68xf32>
    %86 = vector.broadcast %25 : vector<1x68xf32> to vector<8x68xf32>
    %87 = arith.addf %85, %86 : vector<8x68xf32>
    %cst_80 = arith.constant 0.000000e+00 : f32
    %88 = vector.broadcast %cst_80 : f32 to vector<8x68xf32>
    %89 = arith.maximumf %87, %88 : vector<8x68xf32>
    %90 = arith.addf %19, %89 : vector<8x68xf32>
    %c0_81 = arith.constant 0 : index
    %c0_82 = arith.constant 0 : index
    %91 = vector.load %arg12[%c0_81, %c0_82] : memref<68x128xf32, #tpu.memory_space<vmem>>, vector<68x128xf32>
    %cst_83 = arith.constant dense<0.000000e+00> : vector<8x128xf32>
    %92 = tpu.matmul %90, %91, %cst_83 {dimension_numbers = #tpu.dot_dimension_numbers<[1], [0], [0], [1], [0, 0, 1, 1], [], []>} : vector<8x68xf32>, vector<68x128xf32>, vector<8x128xf32> -> vector<8x128xf32>
    %c0_84 = arith.constant 0 : index
    %c0_85 = arith.constant 0 : index
    %93 = vector.load %arg13[%c0_84, %c0_85] : memref<1x128xf32, #tpu.memory_space<vmem>>, vector<1x128xf32>
    %94 = vector.broadcast %93 : vector<1x128xf32> to vector<8x128xf32>
    %95 = arith.addf %92, %94 : vector<8x128xf32>
    %cst_86 = arith.constant dense<0xFF800000> : vector<8xf32>
    %96 = vector.multi_reduction <maximumf>, %95, %cst_86 [1] : vector<8x128xf32> to vector<8xf32>
    %97 = vector.shape_cast %96 : vector<8xf32> to vector<8x1xf32>
    %98 = vector.broadcast %97 : vector<8x1xf32> to vector<8x128xf32>
    %99 = arith.subf %95, %98 : vector<8x128xf32>
    %100 = math.exp %99 : vector<8x128xf32>
    %cst_87 = arith.constant dense<0.000000e+00> : vector<8xf32>
    %101 = vector.multi_reduction <add>, %100, %cst_87 [1] : vector<8x128xf32> to vector<8xf32>
    %102 = vector.shape_cast %101 : vector<8xf32> to vector<8x1xf32>
    %103 = math.log %102 : vector<8x1xf32>
    %104 = vector.broadcast %103 : vector<8x1xf32> to vector<8x128xf32>
    %105 = arith.subf %99, %104 : vector<8x128xf32>
    %c0_88 = arith.constant 0 : index
    %c0_89 = arith.constant 0 : index
    %c0_90 = arith.constant 0 : index
    %106 = vector.load %arg14[%c0_88, %c0_89, %c0_90] : memref<1x8x128xf32, #tpu.memory_space<vmem>>, vector<1x8x128xf32>
    %107 = vector.shape_cast %106 : vector<1x8x128xf32> to vector<8x128xf32>
    %108 = vector.shape_cast %105 : vector<8x128xf32> to vector<1x8x128xf32>
    tpu.vector_store %arg14[%c0_88, %c0_89, %c0_90], %108 {strides = array<i32>} : memref<1x8x128xf32, #tpu.memory_space<vmem>>, vector<1x8x128xf32>,
    return
  }
  func.func @transform_0(%arg0: i32) -> (i32, i32, i32) {
    %c0_i32 = arith.constant 0 : i32
    %c0_i32_0 = arith.constant 0 : i32
    %c0_i32_1 = arith.constant 0 : i32
    return %arg0, %c0_i32, %c0_i32_0 : i32, i32, i32
  }
  func.func @transform_1(%arg0: i32) -> (i32, i32, i32) {
    %c0_i32 = arith.constant 0 : i32
    %c0_i32_0 = arith.constant 0 : i32
    %c0_i32_1 = arith.constant 0 : i32
    return %arg0, %c0_i32, %c0_i32_0 : i32, i32, i32
  }
  func.func @transform_2(%arg0: i32) -> (i32, i32, i32) {
    %c0_i32 = arith.constant 0 : i32
    %c0_i32_0 = arith.constant 0 : i32
    %c0_i32_1 = arith.constant 0 : i32
    %c0_i32_2 = arith.constant 0 : i32
    return %c0_i32, %c0_i32_0, %c0_i32_1 : i32, i32, i32
  }
  func.func @transform_3(%arg0: i32) -> (i32, i32) {
    %c0_i32 = arith.constant 0 : i32
    %c0_i32_0 = arith.constant 0 : i32
    %c0_i32_1 = arith.constant 0 : i32
    return %c0_i32, %c0_i32_0 : i32, i32
  }
  func.func @transform_4(%arg0: i32) -> (i32, i32, i32) {
    %c0_i32 = arith.constant 0 : i32
    %c0_i32_0 = arith.constant 0 : i32
    %c0_i32_1 = arith.constant 0 : i32
    %c0_i32_2 = arith.constant 0 : i32
    return %c0_i32, %c0_i32_0, %c0_i32_1 : i32, i32, i32
  }
  func.func @transform_5(%arg0: i32) -> (i32, i32) {
    %c0_i32 = arith.constant 0 : i32
    %c0_i32_0 = arith.constant 0 : i32
    %c0_i32_1 = arith.constant 0 : i32
    return %c0_i32, %c0_i32_0 : i32, i32
  }
  func.func @transform_6(%arg0: i32) -> (i32, i32, i32) {
    %c0_i32 = arith.constant 0 : i32
    %c0_i32_0 = arith.constant 0 : i32
    %c0_i32_1 = arith.constant 0 : i32
    %c0_i32_2 = arith.constant 0 : i32
    return %c0_i32, %c0_i32_0, %c0_i32_1 : i32, i32, i32
  }
  func.func @transform_7(%arg0: i32) -> (i32, i32) {
    %c0_i32 = arith.constant 0 : i32
    %c0_i32_0 = arith.constant 0 : i32
    %c0_i32_1 = arith.constant 0 : i32
    return %c0_i32, %c0_i32_0 : i32, i32
  }
  func.func @transform_8(%arg0: i32) -> (i32, i32) {
    %c0_i32 = arith.constant 0 : i32
    %c0_i32_0 = arith.constant 0 : i32
    %c0_i32_1 = arith.constant 0 : i32
    return %c0_i32, %c0_i32_0 : i32, i32
  }
  func.func @transform_9(%arg0: i32) -> (i32, i32) {
    %c0_i32 = arith.constant 0 : i32
    %c0_i32_0 = arith.constant 0 : i32
    %c0_i32_1 = arith.constant 0 : i32
    return %c0_i32, %c0_i32_0 : i32, i32
  }
  func.func @transform_10(%arg0: i32) -> (i32, i32) {
    %c0_i32 = arith.constant 0 : i32
    %c0_i32_0 = arith.constant 0 : i32
    %c0_i32_1 = arith.constant 0 : i32
    return %c0_i32, %c0_i32_0 : i32, i32
  }
  func.func @transform_11(%arg0: i32) -> (i32, i32) {
    %c0_i32 = arith.constant 0 : i32
    %c0_i32_0 = arith.constant 0 : i32
    %c0_i32_1 = arith.constant 0 : i32
    return %c0_i32, %c0_i32_0 : i32, i32
  }
  func.func @transform_12(%arg0: i32) -> (i32, i32) {
    %c0_i32 = arith.constant 0 : i32
    %c0_i32_0 = arith.constant 0 : i32
    %c0_i32_1 = arith.constant 0 : i32
    return %c0_i32, %c0_i32_0 : i32, i32
  }
  func.func @transform_13(%arg0: i32) -> (i32, i32, i32) {
    %c0_i32 = arith.constant 0 : i32
    %c0_i32_0 = arith.constant 0 : i32
    %c0_i32_1 = arith.constant 0 : i32
    return %arg0, %c0_i32, %c0_i32_0 : i32, i32, i32
  }
}

</mosaic_0001>

<bundles_post_ra>
// kernel: conv_res_forward.1
= control target key start
LH: loop header
LB: loop body
LE: loop exit
PB: predicated region body
PF: predicated region fallthrough
CT: control target
= control target key end

     0   :  { %s2506_s25 = smov 0   ;;  %s2975_s0 = inlined_call_operand.vmem [shape: f32[2,16,33], index: 0, kind: input, shape index: {}]   ;;  %s2976_s1 = inlined_call_operand.vmem [shape: f32[2,16,33], index: 1, kind: input, shape index: {}]   ;;  %s2977_s2 = inlined_call_operand.vmem [shape: f32[3,33,68], index: 2, kind: input, shape index: {}]   ;;  %s2978_s3 = inlined_call_operand.vmem [shape: f32[1,68], index: 3, kind: input, shape index: {}]   ;;  %s2979_s4 = inlined_call_operand.vmem [shape: f32[3,68,68], index: 4, kind: input, shape index: {}]   ;;  %s2980_s5 = inlined_call_operand.vmem [shape: f32[1,68], index: 5, kind: input, shape index: {}]   ;;  %s2981_s6 = inlined_call_operand.vmem [shape: f32[3,68,68], index: 6, kind: input, shape index: {}]   ;;  %s2982_s7 = inlined_call_operand.vmem [shape: f32[1,68], index: 7, kind: input, shape index: {}]   ;;  %s2983_s8 = inlined_call_operand.vmem [shape: f32[68,68], index: 8, kind: input, shape index: {}]   ;;  %s2984_s9 = inlined_call_operand.vmem [shape: f32[1,68], index: 9, kind: input, shape index: {}]   ;;  %s2985_s10 = inlined_call_operand.vmem [shape: f32[1,68], index: 10, kind: input, shape index: {}]   ;;  %s2986_s11 = inlined_call_operand.vmem [shape: f32[68,128], index: 11, kind: input, shape index: {}]   ;;  %s2987_s12 = inlined_call_operand.vmem [shape: f32[1,128], index: 12, kind: input, shape index: {}]   ;;  %s2988_s13 = inlined_call_operand.vmem [shape: f32[2,8,128], index: 13, kind: output, shape index: {}]  }
   0x1 LB: > { %s1764_s26 = sadd.s32 4294967295, %s2431_s25   ;;  %p1768_p0 = scmp.ge.s32.totalorder %s2431_s25, 1  ;;  %s2431_s25 = sphi %s2506_s25, %s23_s25  }
   0x2   : > { %p397_p1 = scmp.lt.s32.totalorder %s2431_s25, 3 }
   0x4   : > { %p398_p2 = pnand %p1768_p0, %p397_p1 }
   0x5   : > { %v1774_v0 = vld [vmem:[%s2977_s2 + $0x28] sm:$0xff] (!%p398_p2)  ;;  %v1775_v1 = vld [vmem:[%s2977_s2 + $0x30] sm:$0xff] (!%p398_p2)  ;;  %v460_v2 = vld [vmem:[%s2977_s2] sm:$0xff] (!%p398_p2)  ;;  %v2433_v3 = vmov (!%p398_p2), 0.0|0.0   ;;  %p445_p3 = scmp.lt.s32.totalorder (!%p398_p2), %s1764_s26, 1  ;;  %vm2434_vm0 = vmmov (!%p398_p2), 0  }
   0x6   : > { %401 = sbr.rel (%p398_p2) target bundleno = 2157 (0x86d), region = 72  ;;  %2256 = vmatprep.subr.bf16.mxu0 (!%p398_p2), %v2433_v3  ;;  %v2257_v4 = vpack.c.bf16 (!%p398_p2), %v1775_v1, %v1774_v0  ;;  %2262 = vmatprep.subr.bf16.mxu1 (!%p398_p2), %v2433_v3  ;;  %v461_v5 = vld [vmem:[%s2977_s2 + $0x8] sm:$0xff] (!%p398_p2)  ;;  %v1776_v6 = vld [vmem:[%s2977_s2 + $0x38] sm:$0xff] (!%p398_p2)  ;;  %v1777_v7 = vld [vmem:[%s2977_s2 + $0x40] sm:$0xff] (!%p398_p2)  ;;  %v2435_v11 = vmov (!%p398_p2), 0.0   ;;  %vm476_vm1 = vcmask (!%p398_p2), 1040384  }
   0x7   : > { %v2263_v8 = vpack.c.bf16 (!%p398_p2), %v461_v5, %v460_v2  ;;  %v462_v9 = vld [vmem:[%s2977_s2 + $0x10] sm:$0xff] (!%p398_p2)  ;;  %v463_v10 = vld [vmem:[%s2977_s2 + $0x18] sm:$0xff] (!%p398_p2)  ;;  %1996 = vmatprep.mubr.msk.f32.mxu0 (!%p398_p2), %vm2434_vm0, %v2435_v11  ;;  %2009 = vmatprep.mubr.msk.f32.mxu1 (!%p398_p2), %vm2434_vm0, %v2435_v11  ;;  %v2260_v12 = vpack.c.bf16 (!%p398_p2), %v1777_v7, %v1776_v6  ;;  %v1778_v16 = vld [vmem:[%s2977_s2 + $0x48] sm:$0x1] (!%p398_p2)  ;;  %vm472_vm2 = vcmask (!%p398_p2), 269312   ;;  %vm718_vm3 = vcmask (!%p398_p2), 548864  }
   0x8   : > { %2258 = vmatpush3.bf16.msra.mxu0 (!%p398_p2), %v2257_v4  ;;  %v2266_v13 = vpack.c.bf16 (!%p398_p2), %v463_v10, %v462_v9  ;;  %v1783_v14 = vld [vmem:[%s2977_s2 + $0x50] sm:$0xff] (!%p398_p2)  ;;  %v1784_v15 = vld [vmem:[%s2977_s2 + $0x58] sm:$0xff] (!%p398_p2)  ;;  %v464_v18 = vld [vmem:[%s2977_s2 + $0x20] sm:$0x1] (!%p398_p2)  ;;  %719 = vst.msk [vmem:[#allocation2] sm:$0x1] (!%p398_p2), %vm718_vm3, %v2435_v11 }
   0x9   : > { %2264 = vmatpush3.bf16.msra.mxu1 (!%p398_p2), %v2263_v8  ;;  %2259 = vmatprep.subr.bf16.mxu0 (!%p398_p2), %v2433_v3  ;;  %v2269_v20 = vpack.c.bf16 (!%p398_p2), %v1784_v15, %v1783_v14  ;;  %v1785_v21 = vld [vmem:[%s2977_s2 + $0x60] sm:$0xff] (!%p398_p2)  ;;  %v1786_v22 = vld [vmem:[%s2977_s2 + $0x68] sm:$0xff] (!%p398_p2)  ;;  %v1787_v24 = vld [vmem:[%s2977_s2 + $0x70] sm:$0x1] (!%p398_p2)  ;;  %720 = vst.msk [vmem:[#allocation2 + $0x9] sm:$0x1] (!%p398_p2), %vm718_vm3, %v2435_v11 }
   0xa   : > { %2265 = vmatprep.subr.bf16.mxu1 (!%p398_p2), %v2433_v3  ;;  %v2272_v23 = vpack.c.bf16 (!%p398_p2), %v1786_v22, %v1785_v21  ;;  %v1791_v26 = vld [vmem:[%s2979_s4 + $0x48] sm:$0xff] (!%p398_p2)  ;;  %v1792_v27 = vld [vmem:[%s2979_s4 + $0x50] sm:$0xff] (!%p398_p2)  ;;  %v736_v28 = vld [vmem:[%s2979_s4] sm:$0xff] (!%p398_p2)  ;;  %vm759_vm4 = vcmask (!%p398_p2), 1043456   ;;  %vm732_vm5 = vcmask (!%p398_p2), 556032  }
   0xb   : > { %v2275_v29 = vpack.c.bf16 (!%p398_p2), %v1792_v27, %v1791_v26  ;;  %v737_v30 = vld [vmem:[%s2979_s4 + $0x8] sm:$0xff] (!%p398_p2)  ;;  %v1793_v31 = vld [vmem:[%s2979_s4 + $0x58] sm:$0xff] (!%p398_p2)  ;;  %v1794_v32 = vld [vmem:[%s2979_s4 + $0x60] sm:$0xff] (!%p398_p2) }
   0xc   : > { %2261 = vmatpush3.bf16.msra.mxu0 (!%p398_p2), %v2260_v12  ;;  %v2287_v33 = vpack.c.bf16 (!%p398_p2), %v737_v30, %v736_v28  ;;  %v2278_v34 = vpack.c.bf16 (!%p398_p2), %v1794_v32, %v1793_v31  ;;  %v738_v35 = vld [vmem:[%s2979_s4 + $0x10] sm:$0xff] (!%p398_p2)  ;;  %v739_v36 = vld [vmem:[%s2979_s4 + $0x18] sm:$0xff] (!%p398_p2)  ;;  %v1795_v38 = vld [vmem:[%s2979_s4 + $0x68] sm:$0xff] (!%p398_p2) }
   0xd   : > { %s2990_s26 = smov (!%p445_p3, %s1764_s26), 1  ;;  %2267 = vmatpush3.bf16.msra.mxu1 %v2266_v13  ;;  %1994 = vmatprep.subr.mxu0 %v2435_v11  ;;  %v2290_v37 = vpack.c.bf16 %v739_v36, %v738_v35  ;;  %v1796_v39 = vld [vmem:[%s2979_s4 + $0x70] sm:$0xff]  ;;  %v740_v41 = vld [vmem:[%s2979_s4 + $0x20] sm:$0xff]  ;;  %v741_v42 = vld [vmem:[%s2979_s4 + $0x28] sm:$0xff] }
   0xe   : > { %s1856_s28 = sshll.u32 %s2990_s26, 4  ;;  %2007 = vmatprep.subr.mxu1 %v2435_v11  ;;  %v2281_v40 = vpack.c.bf16 %v1796_v39, %v1795_v38  ;;  %v2293_v43 = vpack.c.bf16 %v741_v42, %v740_v41  ;;  %v1797_v44 = vld [vmem:[%s2979_s4 + $0x78] sm:$0xff]  ;;  %v1798_v45 = vld [vmem:[%s2979_s4 + $0x80] sm:$0xff]  ;;  %v742_v47 = vld [vmem:[%s2979_s4 + $0x30] sm:$0xff] }
   0xf   : > { %s454_s14 = scalar_lea.vmem %s2976_s1, %s1856_s28  ;;  %s449_s17 = scalar_lea.vmem %s2975_s0, %s1856_s28  ;;  %v2284_v46 = vpack.c.bf16 %v1798_v45, %v1797_v44  ;;  %v743_v48 = vld [vmem:[%s2979_s4 + $0x38] sm:$0xff]  ;;  %v1799_v50 = vld [vmem:[%s2979_s4 + $0x88] sm:$0xf]  ;;  %v744_v51 = vld [vmem:[%s2979_s4 + $0x40] sm:$0xf] }
  0x10   : > { %v465_v17 = vld [vmem:[%s454_s14] sm:$0xff]  ;;  %1995 = vmatpush3.msk.msra.mxu0 %vm476_vm1, %v1778_v16  ;;  %v2296_v49 = vpack.c.bf16 %v743_v48, %v742_v47  ;;  %v1804_v62 = vld [vmem:[%s2979_s4 + $0x90] sm:$0xff]  ;;  %v1805_v63 = vld [vmem:[%s2979_s4 + $0x98] sm:$0xff] }
  0x11   : > { %v459_v19 = vld [vmem:[%s449_s17] sm:$0xff]  ;;  %1997 = vmatmul.mubr.msk.f32.vlgmr.msra.gmra.mrb[0].mxu0 %vm472_vm2, %v465_v17  ;;  %2008 = vmatpush3.msk.msra.mxu1 %vm476_vm1, %v464_v18  ;;  %v2299_v0 = vpack.c.bf16 %v1805_v63, %v1804_v62  ;;  %v1807_v2 = vld [vmem:[%s2979_s4 + $0xa8] sm:$0xff]  ;;  %v1808_v7 = vld [vmem:[%s2979_s4 + $0xb0] sm:$0xff] }
  0x12   : > { %2268 = vmatprep.subr.bf16.mxu0 %v2433_v3  ;;  %2010 = vmatmul.mubr.msk.f32.vlgmr.msra.gmra.mrb[0].mxu1 %vm472_vm2, %v459_v19  ;;  %v626_v25 = vld [vmem:[%s449_s17 + $0x1] sm:$0xff]  ;;  %v1790_v58 = vld [vmem:[%s2978_s3] ss:$0 sm:$0xff]  ;;  %v1809_v8 = vld [vmem:[%s2979_s4 + $0xb8] sm:$0xff]  ;;  %s1773_s17 = sshll.u32 %s2990_s26, 3 }
  0x13   : > { %2270 = vmatpush3.bf16.msra.mxu0 %v2269_v20  ;;  %2022 = vmatprep.mubr.msk.f32.mxu0 %vm2434_vm0, %v2435_v11  ;;  %v1806_v1 = vld [vmem:[%s2979_s4 + $0xa0] sm:$0xff]  ;;  %v2305_v9 = vpack.c.bf16 %v1809_v8, %v1808_v7  ;;  %v1811_v12 = vld [vmem:[%s2979_s4 + $0xc8] sm:$0xff]  ;;  %v1812_v14 = vld [vmem:[%s2979_s4 + $0xd0] sm:$0xf]  ;;  %s458_s28 = scalar_lea.vmem %s2988_s13, %s1773_s17 }
  0x14   : > { %2271 = vmatprep.subr.bf16.mxu0 %v2433_v3  ;;  %2274 = vmatprep.subr.bf16.mxu1 %v2433_v3  ;;  %v2302_v6 = vpack.c.bf16 %v1807_v2, %v1806_v1  ;;  %v1810_v10 = vld [vmem:[%s2979_s4 + $0xc0] sm:$0xff]  ;;  %v722_v17 = vld [vmem:[%s2983_s8 + $0x8] sm:$0xff]  ;;  %v723_v18 = vld [vmem:[%s2983_s8 + $0x10] sm:$0xff] }
  0x15   : > { %2043 = vmatprep.mubr.msk.f32.mxu1 %vm2434_vm0, %v2435_v11  ;;  %2276 = vmatpush3.bf16.msra.mxu1 %v2275_v29  ;;  %v2308_v13 = vpack.c.bf16 %v1811_v12, %v1810_v10  ;;  %v721_v16 = vld [vmem:[%s2983_s8] sm:$0xff]  ;;  %v724_v20 = vld [vmem:[%s2983_s8 + $0x18] sm:$0xff]  ;;  %v1823_v44 = vld [vmem:[%s2981_s6 + $0x50] sm:$0xff] }
  0x16   : > { %2277 = vmatprep.subr.bf16.mxu1 %v2433_v3  ;;  %v2721_v19 = vpack.c.bf16 %v722_v17, %v721_v16  ;;  %v2727_v21 = vpack.c.bf16 %v724_v20, %v723_v18  ;;  %v725_v22 = vld [vmem:[%s2983_s8 + $0x20] sm:$0xff]  ;;  %v728_v26 = vld [vmem:[%s2983_s8 + $0x38] sm:$0xff]  ;;  %v1176_v47 = vld [vmem:[%s2981_s6 + $0x8] sm:$0xff] }
  0x17   : > { %2273 = vmatpush3.bf16.msra.mxu0 %v2272_v23  ;;  %v726_v23 = vld [vmem:[%s2983_s8 + $0x28] sm:$0xff]  ;;  %v2763_v28 = vld [vmem:[%s2983_s8 + $0x40] sm:$0xf]  ;;  %v1828_v62 = vld [vmem:[%s2981_s6 + $0x78] sm:$0xff] }
  0x18   : > { %2020 = vmatprep.subr.mxu0 %v2435_v11  ;;  %v1829_v63 = vld [vmem:[%s2981_s6 + $0x80] sm:$0xff]  ;;  %v1181_v1 = vld [vmem:[%s2981_s6 + $0x30] sm:$0xff]  ;;  %v1182_v2 = vld [vmem:[%s2981_s6 + $0x38] sm:$0xff] }
  0x19   : > { %2279 = vmatpush3.bf16.msra.mxu1 %v2278_v34  ;;  %v1815_v34 = vld [vmem:[%s2980_s5] ss:$0 sm:$0xff]  ;;  %v1835_v18 = vld [vmem:[%s2981_s6 + $0x90] sm:$0xff]  ;;  %v1836_v20 = vld [vmem:[%s2981_s6 + $0x98] sm:$0xff] }
  0x1a   : > { %2280 = vmatprep.subr.bf16.mxu1 %v2433_v3  ;;  %v2849_v12 = vld [vmem:[%s2984_s9] ss:$0 sm:$0xff] }
  0x1b   : > { %2021 = vmatpush3.msk.msra.mxu0 %vm476_vm1, %v1787_v24  ;;  %v2739_v24 = vpack.c.bf16 %v726_v23, %v725_v22  ;;  %v2359_v22 = vpack.c.bf16 %v1836_v20, %v1835_v18  ;;  %v1837_v23 = vld [vmem:[%s2981_s6 + $0xa0] sm:$0xff] }
  0x1c   : > { %2023 = vmatmul.mubr.msk.f32.vlgmr.msra.gmra.mrb[2].mxu0 %vm472_vm2, %v626_v25  ;;  %2286 = vmatprep.subr.bf16.mxu0 %v2433_v3  ;;  %v727_v25 = vld [vmem:[%s2983_s8 + $0x30] sm:$0xff] }
  0x1d   : > { %2064 = vmatprep.mubr.msk.f32.mxu0 %vm2434_vm0, %v2435_v11  ;;  %2288 = vmatpush3.bf16.msra.mxu0 %v2287_v33  ;;  %v2754_v27 = vpack.c.bf16 %v728_v26, %v727_v25  ;;  %v1838_v25 = vld [vmem:[%s2981_s6 + $0xa8] sm:$0xff] }
  0x1e   : > { %2289 = vmatprep.subr.bf16.mxu0 %v2433_v3  ;;  %2282 = vmatpush3.bf16.msra.mxu1 %v2281_v40 }
  0x1f   : > { %2283 = vmatprep.subr.bf16.mxu1 %v2433_v3 }
  0x21   : > { %2291 = vmatpush3.bf16.msra.mxu0 %v2290_v37 }
  0x22   : > { %2292 = vmatprep.subr.bf16.mxu0 %v2433_v3  ;;  %2285 = vmatpush3.bf16.msra.mxu1 %v2284_v46  ;;  %v1175_v46 = vld [vmem:[%s2981_s6] sm:$0xff] }
  0x23   : > { %2041 = vmatprep.subr.mxu1 %v2435_v11  ;;  %v2347_v48 = vpack.c.bf16 %v1176_v47, %v1175_v46 }
  0x25   : > { %2294 = vmatpush3.bf16.msra.mxu0 %v2293_v43  ;;  %v1822_v43 = vld [vmem:[%s2981_s6 + $0x48] sm:$0xff] }
  0x26   : > { %2295 = vmatprep.subr.bf16.mxu0 %v2433_v3  ;;  %2042 = vmatpush3.msk.msra.mxu1 %vm759_vm4, %v1799_v50  ;;  %v2335_v45 = vpack.c.bf16 %v1823_v44, %v1822_v43  ;;  %v1825_v50 = vld [vmem:[%s2981_s6 + $0x60] sm:$0xff] }
  0x27   : > { %2298 = vmatprep.subr.bf16.mxu1 %v2433_v3 }
  0x29   : > { %2297 = vmatpush3.bf16.msra.mxu0 %v2296_v49  ;;  %v1824_v49 = vld [vmem:[%s2981_s6 + $0x58] sm:$0xff] }
  0x2a   : > { %2062 = vmatprep.subr.mxu0 %v2435_v11 }
  0x2d   : > { %2063 = vmatpush3.msk.msra.mxu0 %vm759_vm4, %v744_v51  ;;  %v2338_v51 = vpack.c.bf16 %v1825_v50, %v1824_v49  ;;  %v1597_v49 = vld [vmem:[%s2986_s11 + $0x8] sm:$0xff] }
  0x2e   : > { %2310 = vmatprep.subr.bf16.mxu0 %v2433_v3 }
  0xe4   : > { %v546_v52 = vpop.f32.mrb[0].mxu0 }
  0xe5   : > { %v1998_v53 = vpop.f32.mrb[1].mxu0  ;;  %v622_v54 = vpop.f32.mrb[0].mxu1 }
  0xe6   : > { %v623_v55 = vadd.f32 %v622_v54, %v546_v52  ;;  %v2011_v56 = vpop.f32.mrb[1].mxu1  ;;  %v1177_v52 = vld [vmem:[%s2981_s6 + $0x10] sm:$0xff]  ;;  %v1178_v53 = vld [vmem:[%s2981_s6 + $0x18] sm:$0xff] }
  0xe7   : > { %v2350_v54 = vpack.c.bf16 %v1178_v53, %v1177_v52  ;;  %v1827_v56 = vld [vmem:[%s2981_s6 + $0x70] sm:$0xff]  ;;  %v1599_v52 = vld [vmem:[%s2986_s11 + $0x18] sm:$0xff] }
  0xef   : > { %v705_v57 = vpop.f32.mrb[2].mxu0 }
  0xf0   : > { %v709_v59 = vadd.f32 %v705_v57, %v623_v55  ;;  %v2024_v60 = vpop.f32.mrb[3].mxu0  ;;  %v1826_v55 = vld [vmem:[%s2981_s6 + $0x68] sm:$0xff] }
  0xf1   : > { %v2341_v57 = vpack.c.bf16 %v1827_v56, %v1826_v55  ;;  %v1601_v55 = vld [vmem:[%s2986_s11 + $0x28] sm:$0xff] }
  0xf2   : > { %v2666_v61 = vadd.f32 %v1790_v58, %v709_v59  ;;  %v1179_v58 = vld [vmem:[%s2981_s6 + $0x20] sm:$0xff]  ;;  %v1180_v59 = vld [vmem:[%s2981_s6 + $0x28] sm:$0xff] }
  0xf3   : > { %v2353_v60 = vpack.c.bf16 %v1180_v59, %v1179_v58  ;;  %v1603_v58 = vld [vmem:[%s2986_s11 + $0x38] sm:$0xff] }
  0xf4   : > { %733 = vst.msk [vmem:[#allocation2 + $0x1] sm:$0xff] %vm732_vm5, %v2666_v61 }
  0xfb   : > { %v745_v4 = vld [vmem:[#allocation2 + $0x1] sm:$0xff] }
  0xfc   : > { %v735_v5 = vld [vmem:[#allocation2] sm:$0xff]  ;;  %2044 = vmatmul.mubr.msk.f32.vlgmr.msra.gmra.mrb[2].mxu1 %vm732_vm5, %v745_v4  ;;  %v2356_v4 = vpack.c.bf16 %v1182_v2, %v1181_v1 }
  0xfd   : > { %2065 = vmatmul.mubr.msk.f32.vlgmr.msra.gmra.mrb[4].mxu0 %vm732_vm5, %v735_v5  ;;  %2300 = vmatpush3.bf16.msra.mxu1 %v2299_v0  ;;  %v909_v15 = vld [vmem:[#allocation2 + $0x2] sm:$0xff]  ;;  %v2344_v0 = vpack.c.bf16 %v1829_v63, %v1828_v62 }
  0xfe   : > { %2085 = vmatprep.mubr.msk.f32.mxu1 %vm2434_vm0, %v2435_v11  ;;  %2301 = vmatprep.subr.bf16.mxu1 %v2433_v3  ;;  %v1830_v5 = vld [vmem:[%s2981_s6 + $0x88] sm:$0xf] }
  0xff   : > { %2106 = vmatprep.mubr.msk.f32.mxu0 %vm2434_vm0, %v2435_v11  ;;  %2312 = vmatpush3.bf16.msra.mxu0 %v2721_v19 }
 0x100   : > { %2313 = vmatprep.subr.bf16.mxu0 %v2433_v3 }
 0x101   : > { %2303 = vmatpush3.bf16.msra.mxu1 %v2302_v6  ;;  %v1183_v6 = vld [vmem:[%s2981_s6 + $0x40] sm:$0xf] }
 0x102   : > { %2304 = vmatprep.subr.bf16.mxu1 %v2433_v3 }
 0x103   : > { %2315 = vmatpush3.bf16.msra.mxu0 %v2727_v21 }
 0x104   : > { %2316 = vmatprep.subr.bf16.mxu0 %v2433_v3 }
 0x105   : > { %2306 = vmatpush3.bf16.msra.mxu1 %v2305_v9 }
 0x106   : > { %2307 = vmatprep.subr.bf16.mxu1 %v2433_v3 }
 0x107   : > { %2318 = vmatpush3.bf16.msra.mxu0 %v2739_v24 }
 0x108   : > { %2319 = vmatprep.subr.bf16.mxu0 %v2433_v3 }
 0x109   : > { %2309 = vmatpush3.bf16.msra.mxu1 %v2308_v13 }
 0x10a   : > { %2083 = vmatprep.subr.mxu1 %v2435_v11 }
 0x10b   : > { %2321 = vmatpush3.bf16.msra.mxu0 %v2754_v27 }
 0x10c   : > { %2104 = vmatprep.subr.mxu0 %v2435_v11 }
 0x10d   : > { %2084 = vmatpush3.msk.msra.mxu1 %vm759_vm4, %v1812_v14  ;;  %v2854_v14 = vld [vmem:[%s2985_s10] ss:$0 sm:$0xff] }
 0x10e   : > { %2086 = vmatmul.mubr.msk.f32.vlgmr.msra.gmra.mrb[4].mxu1 %vm732_vm5, %v909_v15  ;;  %2322 = vmatprep.subr.bf16.mxu1 %v2433_v3 }
 0x10f   : > { %2127 = vmatprep.mubr.msk.f32.mxu1 %vm2434_vm0, %v2435_v11  ;;  %2324 = vmatpush3.bf16.msra.mxu1 %v2721_v19 }
 0x110   : > { %2325 = vmatprep.subr.bf16.mxu1 %v2433_v3  ;;  %2105 = vmatpush3.msk.msra.mxu0 %vm759_vm4, %v2763_v28 }
 0x111   : > { %2334 = vmatprep.subr.bf16.mxu0 %v2433_v3 }
 0x113   : > { %2327 = vmatpush3.bf16.msra.mxu1 %v2727_v21 }
 0x114   : > { %2328 = vmatprep.subr.bf16.mxu1 %v2433_v3 }
 0x117   : > { %2330 = vmatpush3.bf16.msra.mxu1 %v2739_v24 }
 0x118   : > { %2331 = vmatprep.subr.bf16.mxu1 %v2433_v3 }
 0x11b   : > { %2333 = vmatpush3.bf16.msra.mxu1 %v2754_v27 }
 0x11c   : > { %2125 = vmatprep.subr.mxu1 %v2435_v11 }
 0x11f   : > { %2126 = vmatpush3.msk.msra.mxu1 %vm759_vm4, %v2763_v28 }
 0x120   : > { %2346 = vmatprep.subr.bf16.mxu1 %v2433_v3 }
 0x1cf   : > { %v829_v29 = vpop.f32.mrb[2].mxu1 }
 0x1d0   : > { %v905_v30 = vpop.f32.mrb[4].mxu0  ;;  %v2045_v32 = vpop.f32.mrb[3].mxu1 }
 0x1d1   : > { %v906_v31 = vadd.f32 %v905_v30, %v829_v29  ;;  %v2066_v33 = vpop.f32.mrb[5].mxu0  ;;  %v2362_v30 = vpack.c.bf16 %v1838_v25, %v1837_v23  ;;  %v1840_v32 = vld [vmem:[%s2981_s6 + $0xb8] sm:$0xff] }
 0x1e1   : > { %v992_v35 = vpop.f32.mrb[4].mxu1 }
 0x1e2   : > { %v996_v36 = vadd.f32 %v992_v35, %v906_v31  ;;  %v2087_v37 = vpop.f32.mrb[5].mxu1  ;;  %v1839_v31 = vld [vmem:[%s2981_s6 + $0xb0] sm:$0xff]  ;;  %v1842_v35 = vld [vmem:[%s2981_s6 + $0xc8] sm:$0xff] }
 0x1e3   : > { %v2365_v33 = vpack.c.bf16 %v1840_v32, %v1839_v31  ;;  %v1843_v37 = vld [vmem:[%s2981_s6 + $0xd0] sm:$0xf] }
 0x1e4   : > { %v1003_v38 = vadd.f32 %v1815_v34, %v996_v36  ;;  %v1841_v34 = vld [vmem:[%s2981_s6 + $0xc0] sm:$0xff] }
 0x1e5   : > { %v2368_v36 = vpack.c.bf16 %v1842_v35, %v1841_v34 }
 0x1e6   : > { %2107 = vmatmul.mubr.msk.f32.vlgmr.msra.gmra.mrb[6].mxu0 %vm732_vm5, %v1003_v38 }
 0x1e7   : > { %2148 = vmatprep.mubr.msk.f32.mxu0 %vm2434_vm0, %v2435_v11  ;;  %2336 = vmatpush3.bf16.msra.mxu0 %v2335_v45 }
 0x1e8   : > { %2337 = vmatprep.subr.bf16.mxu0 %v2433_v3 }
 0x1eb   : > { %2339 = vmatpush3.bf16.msra.mxu0 %v2338_v51  ;;  %v1598_v51 = vld [vmem:[%s2986_s11 + $0x10] sm:$0xff] }
 0x1ec   : > { %2340 = vmatprep.subr.bf16.mxu0 %v2433_v3  ;;  %v2398_v53 = vpack.c.bf16 %v1599_v52, %v1598_v51 }
 0x1ef   : > { %2342 = vmatpush3.bf16.msra.mxu0 %v2341_v57  ;;  %v1602_v57 = vld [vmem:[%s2986_s11 + $0x30] sm:$0xff] }
 0x1f0   : > { %2343 = vmatprep.subr.bf16.mxu0 %v2433_v3  ;;  %v2404_v59 = vpack.c.bf16 %v1603_v58, %v1602_v57 }
 0x1f3   : > { %2345 = vmatpush3.bf16.msra.mxu0 %v2344_v0 }
 0x1f4   : > { %2146 = vmatprep.subr.mxu0 %v2435_v11 }
 0x1f7   : > { %2147 = vmatpush3.msk.msra.mxu0 %vm759_vm4, %v1830_v5 }
 0x1f8   : > { %2358 = vmatprep.subr.bf16.mxu0 %v2433_v3 }
 0x2b9   : > { %v1076_v39 = vpop.f32.mrb[6].mxu0 }
 0x2ba   : > { %v1080_v40 = vsub.f32 %v1003_v38, %v1076_v39  ;;  %v2108_v41 = vpop.f32.mrb[7].mxu0 }
 0x2bc   : > { %v1081_v42 = vmul.f32 %v1080_v40, %v1080_v40 }
 0x2be   : > { %2128 = vmatmul.mubr.msk.f32.vlgmr.msra.gmra.mrb[6].mxu1 %vm732_vm5, %v1081_v42 }
 0x2bf   : > { %2169 = vmatprep.mubr.msk.f32.mxu1 %vm2434_vm0, %v2435_v11  ;;  %2348 = vmatpush3.bf16.msra.mxu1 %v2347_v48  ;;  %v1596_v48 = vld [vmem:[%s2986_s11] sm:$0xff] }
 0x2c0   : > { %2349 = vmatprep.subr.bf16.mxu1 %v2433_v3  ;;  %v2395_v50 = vpack.c.bf16 %v1597_v49, %v1596_v48 }
 0x2c3   : > { %2351 = vmatpush3.bf16.msra.mxu1 %v2350_v54  ;;  %v1600_v54 = vld [vmem:[%s2986_s11 + $0x20] sm:$0xff] }
 0x2c4   : > { %2352 = vmatprep.subr.bf16.mxu1 %v2433_v3  ;;  %v2401_v56 = vpack.c.bf16 %v1601_v55, %v1600_v54 }
 0x2c7   : > { %2354 = vmatpush3.bf16.msra.mxu1 %v2353_v60  ;;  %v1604_v60 = vld [vmem:[%s2986_s11 + $0x40] sm:$0xf] }
 0x2c8   : > { %2355 = vmatprep.subr.bf16.mxu1 %v2433_v3 }
 0x2cb   : > { %2357 = vmatpush3.bf16.msra.mxu1 %v2356_v4 }
 0x2cc   : > { %2167 = vmatprep.subr.mxu1 %v2435_v11 }
 0x2cf   : > { %2168 = vmatpush3.msk.msra.mxu1 %vm759_vm4, %v1183_v6  ;;  %v1851_v6 = vld [vmem:[%s2987_s12] ss:$0 sm:$0xff] }
 0x2d0   : > { %2370 = vmatprep.subr.bf16.mxu1 %v2433_v3 }
 0x391   : > { %v1151_v7 = vpop.f32.mrb[6].mxu1 }
 0x392   : > { %v1152_v8 = vadd.f32 1e-05, %v1151_v7  ;;  %v2129_v9 = vpop.f32.mrb[7].mxu1 }
 0x394   : > { %2417 = vrsqrt.f32 %v1152_v8 }
 0x39e   : > { %v2418_v10 = vpop.eup %2417 }
 0x39f   : > { %v1156_v13 = vmul.f32 %v2418_v10, %v1080_v40 }
 0x3a1   : > { %v1163_v15 = vmul.f32 %v2849_v12, %v1156_v13 }
 0x3a3   : > { %v1170_v16 = vadd.f32 %v2854_v14, %v1163_v15 }
 0x3a5   : > { %v1171_v17 = vmax.f32 %v1170_v16, 0.0 }
 0x3a7   : > { %1172 = vst.msk [vmem:[#allocation2 + $0x1] sm:$0xff] %vm732_vm5, %v1171_v17 }
 0x3ae   : > { %v1184_v26 = vld [vmem:[#allocation2 + $0x1] sm:$0xff] }
 0x3af   : > { %v1174_v29 = vld [vmem:[#allocation2] sm:$0xff]  ;;  %2149 = vmatmul.mubr.msk.f32.vlgmr.msra.gmra.mrb[8].mxu0 %vm732_vm5, %v1184_v26 }
 0x3b0   : > { %2170 = vmatmul.mubr.msk.f32.vlgmr.msra.gmra.mrb[8].mxu1 %vm732_vm5, %v1174_v29  ;;  %2360 = vmatpush3.bf16.msra.mxu0 %v2359_v22  ;;  %v1347_v38 = vld [vmem:[#allocation2 + $0x2] sm:$0xff] }
 0x3b1   : > { %2190 = vmatprep.mubr.msk.f32.mxu0 %vm2434_vm0, %v2435_v11  ;;  %2361 = vmatprep.subr.bf16.mxu0 %v2433_v3 }
 0x3b2   : > { %2372 = vmatpush3.bf16.msra.mxu1 %v2721_v19  ;;  %2211 = vmatprep.mubr.msk.f32.mxu1 %vm2434_vm0, %v2435_v11 }
 0x3b3   : > { %2373 = vmatprep.subr.bf16.mxu1 %v2433_v3 }
 0x3b4   : > { %2363 = vmatpush3.bf16.msra.mxu0 %v2362_v30 }
 0x3b5   : > { %2364 = vmatprep.subr.bf16.mxu0 %v2433_v3 }
 0x3b6   : > { %2375 = vmatpush3.bf16.msra.mxu1 %v2727_v21 }
 0x3b7   : > { %2376 = vmatprep.subr.bf16.mxu1 %v2433_v3 }
 0x3b8   : > { %2366 = vmatpush3.bf16.msra.mxu0 %v2365_v33 }
 0x3b9   : > { %2367 = vmatprep.subr.bf16.mxu0 %v2433_v3 }
 0x3ba   : > { %2378 = vmatpush3.bf16.msra.mxu1 %v2739_v24 }
 0x3bb   : > { %2379 = vmatprep.subr.bf16.mxu1 %v2433_v3 }
 0x3bc   : > { %2369 = vmatpush3.bf16.msra.mxu0 %v2368_v36 }
 0x3bd   : > { %2188 = vmatprep.subr.mxu0 %v2435_v11 }
 0x3be   : > { %2381 = vmatpush3.bf16.msra.mxu1 %v2754_v27 }
 0x3bf   : > { %2209 = vmatprep.subr.mxu1 %v2435_v11 }
 0x3c0   : > { %2189 = vmatpush3.msk.msra.mxu0 %vm759_vm4, %v1843_v37 }
 0x3c1   : > { %2191 = vmatmul.mubr.msk.f32.vlgmr.msra.gmra.mrb[10].mxu0 %vm732_vm5, %v1347_v38  ;;  %2382 = vmatprep.subr.bf16.mxu0 %v2433_v3 }
 0x3c2   : > { %2210 = vmatpush3.msk.msra.mxu1 %vm759_vm4, %v2763_v28  ;;  %2232 = vmatprep.mubr.msk.f32.mxu0 %vm2434_vm0, %v2435_v11 }
 0x3c3   : > { %2384 = vmatpush3.bf16.msra.mxu0 %v2721_v19  ;;  %2394 = vmatprep.subr.bf16.mxu1 %v2433_v3 }
 0x3c4   : > { %2385 = vmatprep.subr.bf16.mxu0 %v2433_v3 }
 0x3c7   : > { %2387 = vmatpush3.bf16.msra.mxu0 %v2727_v21  ;;  %v1846_v21 = vld [vmem:[%s2982_s7] ss:$0 sm:$0xff] }
 0x3c8   : > { %2388 = vmatprep.subr.bf16.mxu0 %v2433_v3 }
 0x3cb   : > { %2390 = vmatpush3.bf16.msra.mxu0 %v2739_v24 }
 0x3cc   : > { %2391 = vmatprep.subr.bf16.mxu0 %v2433_v3 }
 0x3cf   : > { %2393 = vmatpush3.bf16.msra.mxu0 %v2754_v27 }
 0x3d0   : > { %2230 = vmatprep.subr.mxu0 %v2435_v11 }
 0x3d3   : > { %2231 = vmatpush3.msk.msra.mxu0 %vm759_vm4, %v2763_v28 }
 0x482   : > { %v1267_v19 = vpop.f32.mrb[8].mxu0 }
 0x483   : > { %v1343_v39 = vpop.f32.mrb[8].mxu1  ;;  %v2150_v41 = vpop.f32.mrb[9].mxu0 }
 0x484   : > { %v1344_v40 = vadd.f32 %v1343_v39, %v1267_v19  ;;  %v2171_v42 = vpop.f32.mrb[9].mxu1 }
 0x494   : > { %v1430_v43 = vpop.f32.mrb[10].mxu0 }
 0x495   : > { %v1434_v24 = vadd.f32 %v1430_v43, %v1344_v40  ;;  %v2192_v44 = vpop.f32.mrb[11].mxu0 }
 0x497   : > { %v1441_v45 = vadd.f32 %v1846_v21, %v1434_v24 }
 0x499   : > { %2212 = vmatmul.mubr.msk.f32.vlgmr.msra.gmra.mrb[10].mxu1 %vm732_vm5, %v1441_v45 }
 0x49a   : > { %2253 = vmatprep.mubr.msk.f32.mxu1 %vm2434_vm0, %v2435_v11  ;;  %2396 = vmatpush3.bf16.msra.mxu1 %v2395_v50 }
 0x49b   : > { %2397 = vmatprep.subr.bf16.mxu1 %v2433_v3 }
 0x49e   : > { %2399 = vmatpush3.bf16.msra.mxu1 %v2398_v53 }
 0x49f   : > { %2400 = vmatprep.subr.bf16.mxu1 %v2433_v3 }
 0x4a2   : > { %2402 = vmatpush3.bf16.msra.mxu1 %v2401_v56 }
 0x4a3   : > { %2403 = vmatprep.subr.bf16.mxu1 %v2433_v3 }
 0x4a6   : > { %2405 = vmatpush3.bf16.msra.mxu1 %v2404_v59 }
 0x4a7   : > { %2251 = vmatprep.subr.mxu1 %v2435_v11 }
 0x4aa   : > { %2252 = vmatpush3.msk.msra.mxu1 %vm759_vm4, %v1604_v60 }
 0x56c   : > { %v1511_v27 = vpop.f32.mrb[10].mxu1 }
 0x56d   : > { %v1515_v28 = vsub.f32 %v1441_v45, %v1511_v27  ;;  %v2213_v46 = vpop.f32.mrb[11].mxu1 }
 0x56f   : > { %v1516_v47 = vmul.f32 %v1515_v28, %v1515_v28 }
 0x571   : > { %2233 = vmatmul.mubr.msk.f32.vlgmr.msra.gmra.mrb[12].mxu0 %vm732_vm5, %v1516_v47 }
 0x644   : > { %v1586_v62 = vpop.f32.mrb[12].mxu0 }
 0x645   : > { %v1587_v3 = vadd.f32 1e-05, %v1586_v62  ;;  %v2234_v63 = vpop.f32.mrb[13].mxu0 }
 0x647   : > { %2419 = vrsqrt.f32 %v1587_v3 }
 0x651   : > { %v2420_v0 = vpop.eup %2419 }
 0x652   : > { %v1591_v1 = vmul.f32 %v2420_v0, %v1515_v28 }
 0x654   : > { %v1592_v2 = vmul.f32 %v2849_v12, %v1591_v1 }
 0x656   : > { %v1593_v4 = vadd.f32 %v2854_v14, %v1592_v2 }
 0x658   : > { %v1594_v5 = vmax.f32 %v1593_v4, 0.0 }
 0x65a   : > { %v1595_v11 = vadd.f32 %v1594_v5, %v2666_v61 }
 0x65c   : > { %2254 = vmatmul.mubr.msk.f32.vlgmr.msra.gmra.mrb[12].mxu1 %vm732_vm5, %v1595_v11 }
 0x72f   : > { %v1684_v7 = vpop.f32.mrb[12].mxu1 }
 0x730   : > { %v1685_v8 = vadd.f32 %v1851_v6, %v1684_v7  ;;  %v2255_v9 = vpop.f32.mrb[13].mxu1 }
 0x732   : > { %1688 = vmax.xlane.f32.xlu0 %v1685_v8 }
 0x7bf   : > { %v1689_v10 = vpop.xlane.xlu0 %1688 }
 0x7c0   : > { %v1690_v13 = vsub.f32 %v1685_v8, %v1689_v10 }
 0x7c2   : > { %v1691_v15 = vmul.f32 1.442695, %v1690_v13 }
 0x7c4   : > { %2421 = vpow2.f32 %v1691_v15 }
 0x7ce   : > { %v2422_v12 = vpop.eup %2421 }
 0x7cf   : > { %1693 = vadd.xlane.f32.xlu0 %v2422_v12 }
 0x85c   : > { %v1694_v14 = vpop.xlane.xlu0 %1693 }
 0x85d   : > { %2423 = vlog2.f32 %v1694_v14 }
 0x867   : > { %v2424_v61 = vpop.eup %2423 }
 0x868   : > { %v1696_v16 = vmul.f32 0.6931472, %v2424_v61 }
 0x86a   : > { %v1697_v17 = vsub.f32 %v1690_v13, %v1696_v16 }
 0x86c   : > { %1698 = vst [vmem:[%s458_s28] sm:$0xff] %v1697_v17 }
 0x86d PF: > { %s23_s25 = sadd.s32 1, %s2431_s25  }
 0x86e   : > { %p20_p4 = scmp.ge.s32.totalorder %s23_s25, 4  }
 0x870   :  { %22 = sbr.rel (!%p20_p4) target bundleno = 1 (0x1), region = 111 }

</bundles_post_ra>
